<compile_context>
chip_gen: v7x
topology: tpu7x:2x2x1
jax: 0.10.0
libtpu: 0.0.40
codegen_flags: <defaults>
</compile_context>

<pallas_src>
import jax
import jax.numpy as jnp
from jax.experimental import pallas as pl
from jax.experimental.pallas import tpu as pltpu


def _round_up(x, m):
    return (x + m - 1) // m * m


# ---------------------------------------------------------------------------
# Pallas kernel: refolded feature interaction + 4 linear layers (3x ReLU).
# ---------------------------------------------------------------------------
def mlp_kernel(s1_ref, s2_ref,
               w1a_ref, w1b_ref, w1p_ref,   # refolded layer-1 weights, bf16 [E,H]
               w2_ref, w3_ref, w4_ref,      # bf16 [H,H], [H,H], [H,C_pad]
               b123_ref,                    # f32 [3,H]  (b1,b2,b3 stacked)
               b4_ref,                      # f32 [1,C_pad]
               o_ref):                      # f32 [TB,C_pad]
    f32 = jnp.float32
    bf16 = jnp.bfloat16

    s1 = s1_ref[...]           # [TB, E] f32
    s2 = s2_ref[...]
    prod = s1 * s2             # f32 elementwise (v5e-friendly)

    # Layer 1 (refolded):  cat([s1, s2, s1-s2, s1*s2]) @ W1
    #   == s1 @ (W1a + W1c) + s2 @ (W1b - W1c) + (s1*s2) @ W1d
    h = jnp.dot(s1.astype(bf16), w1a_ref[...], preferred_element_type=f32)
    h = h + jnp.dot(s2.astype(bf16), w1b_ref[...], preferred_element_type=f32)
    h = h + jnp.dot(prod.astype(bf16), w1p_ref[...], preferred_element_type=f32)
    h = jnp.maximum(h + b123_ref[0:1, :], 0.0)

    # Layer 2 -> ReLU
    h = jnp.dot(h.astype(bf16), w2_ref[...], preferred_element_type=f32)
    h = jnp.maximum(h + b123_ref[1:2, :], 0.0)

    # Layer 3 -> ReLU   (Dropout(0.1) is identity at inference)
    h = jnp.dot(h.astype(bf16), w3_ref[...], preferred_element_type=f32)
    h = jnp.maximum(h + b123_ref[2:3, :], 0.0)

    # Layer 4 -> logits (lane-dense, zero-padded to C_pad)
    out = jnp.dot(h.astype(bf16), w4_ref[...], preferred_element_type=f32)
    out = out + b4_ref[...]
    o_ref[...] = out.astype(o_ref.dtype)


# ---------------------------------------------------------------------------
# Wrapper: weight refold / bf16 cast / padding / batch-tiled pallas_call.
# ---------------------------------------------------------------------------
def _prepare_params(params):
    (w1, b1, w2, b2, w3, b3, w4, b4) = params
    E4, H = w1.shape
    E = E4 // 4
    C = w4.shape[1]
    C_pad = _round_up(C, 128)

    # Refold W1 in f32, then cast once to bf16.
    w1a, w1b, w1c, w1d = w1[0:E], w1[E:2 * E], w1[2 * E:3 * E], w1[3 * E:4 * E]
    w1_s1 = (w1a + w1c).astype(jnp.bfloat16)
    w1_s2 = (w1b - w1c).astype(jnp.bfloat16)
    w1_pr = w1d.astype(jnp.bfloat16)

    w2_bf = w2.astype(jnp.bfloat16)
    w3_bf = w3.astype(jnp.bfloat16)

    # Zero-pad the final layer to a lane-dense (multiple of 128) output width.
    w4_pad = jnp.zeros((H, C_pad), jnp.float32).at[:, :C].set(w4).astype(jnp.bfloat16)
    b4_pad = jnp.zeros((1, C_pad), jnp.float32).at[:, :C].set(b4)

    # Pack the three hidden-layer biases into one buffer (fewer tiny DMAs).
    b123 = jnp.concatenate([b1, b2, b3], axis=0)  # [3, H] f32

    return (w1_s1, w1_s2, w1_pr, w2_bf, w3_bf, w4_pad, b123, b4_pad), C, C_pad


def mlp_forward(s1_pooled, s2_pooled, params, *, batch_tile=128):
    """s1_pooled, s2_pooled: [B, E] float32. Returns logits [B, C] float32."""
    B, E = s1_pooled.shape
    prepped, C, C_pad = _prepare_params(params)
    (w1_s1, w1_s2, w1_pr, w2_bf, w3_bf, w4_pad, b123, b4_pad) = prepped

    # Batch tiling: TB multiple of 8 (sublane), pad B up to a multiple of TB.
    TB = min(batch_tile, _round_up(B, 8))
    B_pad = _round_up(B, TB)
    if B_pad != B:
        pad = ((0, B_pad - B), (0, 0))
        s1_pooled = jnp.pad(s1_pooled, pad)
        s2_pooled = jnp.pad(s2_pooled, pad)
    n_tiles = B_pad // TB

    def resident(shape):
        # Whole array as one block; constant block index => stays VMEM-resident
        # across grid steps (no re-DMA).
        return pl.BlockSpec(shape, lambda i: tuple(0 for _ in shape))

    out = pl.pallas_call(
        mlp_kernel,
        out_shape=jax.ShapeDtypeStruct((B_pad, C_pad), jnp.float32),
        grid=(n_tiles,),
        in_specs=[
            pl.BlockSpec((TB, E), lambda i: (i, 0)),
            pl.BlockSpec((TB, E), lambda i: (i, 0)),
            resident(w1_s1.shape), resident(w1_s2.shape), resident(w1_pr.shape),
            resident(w2_bf.shape), resident(w3_bf.shape), resident(w4_pad.shape),
            resident(b123.shape), resident(b4_pad.shape),
        ],
        out_specs=pl.BlockSpec((TB, C_pad), lambda i: (i, 0)),
        compiler_params=pltpu.CompilerParams(
            dimension_semantics=("parallel",)),   # v7x: both TCs share batch tiles
    )(s1_pooled, s2_pooled, w1_s1, w1_s2, w1_pr, w2_bf, w3_bf, w4_pad, b123, b4_pad)

    return out[:B, :C]


# ---------------------------------------------------------------------------
# Parameter init (deterministic, mirrors the PyTorch module's init scheme).
# ---------------------------------------------------------------------------
def init_params(key, num_embeddings, embedding_dim, hidden_dim, num_classes):
    keys = jax.random.split(key, 9)

    # nn.Embedding default init: N(0, 1)
    emb = jax.random.normal(keys[0], (num_embeddings, embedding_dim), jnp.float32)

    def linear(kw, kb, fan_in, fan_out):
        # xavier_normal_: std = sqrt(2 / (fan_in + fan_out)); bias ~ N(0, 0.01)
        std = (2.0 / (fan_in + fan_out)) ** 0.5
        w = std * jax.random.normal(kw, (fan_in, fan_out), jnp.float32)
        b = 0.01 * jax.random.normal(kb, (1, fan_out), jnp.float32)
        return w, b

    w1, b1 = linear(keys[1], keys[2], 4 * embedding_dim, hidden_dim)
    w2, b2 = linear(keys[3], keys[4], hidden_dim, hidden_dim)
    w3, b3 = linear(keys[5], keys[6], hidden_dim, hidden_dim)
    w4, b4 = linear(keys[7], keys[8], hidden_dim, num_classes)
    return emb, (w1, b1, w2, b2, w3, b3, w4, b4)


def embed_and_pool(token_ids, emb_table):
    # Embedding lookup + sum over the sequence dim (Dropout is identity at
    # inference).  Gather is glue; kept in plain JAX.
    return jnp.take(emb_table, token_ids, axis=0).sum(axis=1)


# ---------------------------------------------------------------------------
# References for verification.
# ---------------------------------------------------------------------------
def reference_forward_f32(s1_pooled, s2_pooled, params):
    (w1, b1, w2, b2, w3, b3, w4, b4) = params
    x = jnp.concatenate(
        [s1_pooled, s2_pooled, s1_pooled - s2_pooled, s1_pooled * s2_pooled], axis=1)
    h = jnp.maximum(x @ w1 + b1, 0.0)
    h = jnp.maximum(h @ w2 + b2, 0.0)
    h = jnp.maximum(h @ w3 + b3, 0.0)
    return h @ w4 + b4


def reference_forward_bf16(s1_pooled, s2_pooled, params):
    # Matched-precision reference: identical refold + bf16 operands + f32 accum.
    (w1, b1, w2, b2, w3, b3, w4, b4) = params
    E = s1_pooled.shape[1]
    bf, f32 = jnp.bfloat16, jnp.float32
    w1a, w1b, w1c, w1d = w1[0:E], w1[E:2 * E], w1[2 * E:3 * E], w1[3 * E:]
    h = (jnp.dot(s1_pooled.astype(bf), (w1a + w1c).astype(bf), preferred_element_type=f32)
         + jnp.dot(s2_pooled.astype(bf), (w1b - w1c).astype(bf), preferred_element_type=f32)
         + jnp.dot((s1_pooled * s2_pooled).astype(bf), w1d.astype(bf),
                   preferred_element_type=f32))
    h = jnp.maximum(h + b1, 0.0)
    h = jnp.maximum(jnp.dot(h.astype(bf), w2.astype(bf), preferred_element_type=f32) + b2, 0.0)
    h = jnp.maximum(jnp.dot(h.astype(bf), w3.astype(bf), preferred_element_type=f32) + b3, 0.0)
    return jnp.dot(h.astype(bf), w4.astype(bf), preferred_element_type=f32) + b4


if __name__ == "__main__":
    # Small, shape-consistent configuration.
    batch = 8
    seq_len = 8
    num_embeddings = 100
    embedding_dim = 32
    hidden_dim = 32
    num_classes = 3

    key = jax.random.PRNGKey(0)
    k_param, k_s1, k_s2 = jax.random.split(key, 3)

    emb_table, params = init_params(
        k_param, num_embeddings, embedding_dim, hidden_dim, num_classes)

    s1 = jax.random.randint(k_s1, (batch, seq_len), 0, num_embeddings, jnp.int32)
    s2 = jax.random.randint(k_s2, (batch, seq_len), 0, num_embeddings, jnp.int32)
    # l1 / l2 (sequence lengths) are accepted by the PyTorch module but unused
    # in its forward pass; kept here for interface parity.
    l1 = jnp.full((batch,), seq_len, jnp.int32)
    l2 = jnp.full((batch,), seq_len, jnp.int32)

    s1_pooled = embed_and_pool(s1, emb_table)
    s2_pooled = embed_and_pool(s2, emb_table)

    logits = mlp_forward(s1_pooled, s2_pooled, params)
    logits = jax.block_until_ready(logits)
    assert logits.shape == (batch, num_classes)

    # Tight check against the matched-precision (bf16 operand) reference.
    ref_bf16 = reference_forward_bf16(s1_pooled, s2_pooled, params)
    assert jnp.allclose(logits, ref_bf16, atol=2e-3, rtol=2e-3), \
        "mismatch vs matched-precision reference"

    # Looser sanity check against the pure-f32 PyTorch-equivalent reference
    # (difference is only bf16 operand rounding in the matmuls).
    ref_f32 = reference_forward_f32(s1_pooled, s2_pooled, params)
    assert jnp.allclose(logits, ref_f32, atol=1e-1, rtol=1e-1), \
        "mismatch vs f32 reference beyond bf16 tolerance"

    print("KERNEL_OK")
</pallas_src>

<mosaic_0001>
module attributes {stable_mosaic.version = 11 : i64} {
  func.func @mlp_kernel(%arg0: i32, %arg1: memref<8x32xf32, #tpu.memory_space<vmem>>, %arg2: memref<8x32xf32, #tpu.memory_space<vmem>>, %arg3: memref<32x32xbf16, #tpu.memory_space<vmem>>, %arg4: memref<32x32xbf16, #tpu.memory_space<vmem>>, %arg5: memref<32x32xbf16, #tpu.memory_space<vmem>>, %arg6: memref<32x32xbf16, #tpu.memory_space<vmem>>, %arg7: memref<32x32xbf16, #tpu.memory_space<vmem>>, %arg8: memref<32x128xbf16, #tpu.memory_space<vmem>>, %arg9: memref<3x32xf32, #tpu.memory_space<vmem>>, %arg10: memref<1x128xf32, #tpu.memory_space<vmem>>, %arg11: memref<8x128xf32, #tpu.memory_space<vmem>>) attributes {dimension_semantics = [#tpu.dimension_semantics<parallel>], iteration_bounds = array<i64: 1>, scalar_prefetch = 0 : i64, scratch_operands = 0 : i64, tpu.core_type = #tpu.core_type<tc>, window_params = [{transform_indices = @transform_0, window_bounds = array<i64: 8, 32>}, {transform_indices = @transform_1, window_bounds = array<i64: 8, 32>}, {pipeline_mode = #tpu.pipeline_mode<synchronous>, transform_indices = @transform_2, window_bounds = array<i64: 32, 32>}, {pipeline_mode = #tpu.pipeline_mode<synchronous>, transform_indices = @transform_3, window_bounds = array<i64: 32, 32>}, {pipeline_mode = #tpu.pipeline_mode<synchronous>, transform_indices = @transform_4, window_bounds = array<i64: 32, 32>}, {pipeline_mode = #tpu.pipeline_mode<synchronous>, transform_indices = @transform_5, window_bounds = array<i64: 32, 32>}, {pipeline_mode = #tpu.pipeline_mode<synchronous>, transform_indices = @transform_6, window_bounds = array<i64: 32, 32>}, {pipeline_mode = #tpu.pipeline_mode<synchronous>, transform_indices = @transform_7, window_bounds = array<i64: 32, 128>}, {pipeline_mode = #tpu.pipeline_mode<synchronous>, transform_indices = @transform_8, window_bounds = array<i64: 3, 32>}, {pipeline_mode = #tpu.pipeline_mode<synchronous>, transform_indices = @transform_9, window_bounds = array<i64: 1, 128>}, {transform_indices = @transform_10, window_bounds = array<i64: 8, 128>}]} {
    %c0 = arith.constant 0 : index
    %c0_0 = arith.constant 0 : index
    %0 = vector.load %arg1[%c0, %c0_0] : memref<8x32xf32, #tpu.memory_space<vmem>>, vector<8x32xf32>
    %c0_1 = arith.constant 0 : index
    %c0_2 = arith.constant 0 : index
    %1 = vector.load %arg2[%c0_1, %c0_2] : memref<8x32xf32, #tpu.memory_space<vmem>>, vector<8x32xf32>
    %2 = arith.mulf %0, %1 : vector<8x32xf32>
    %3 = arith.truncf %0 : vector<8x32xf32> to vector<8x32xbf16>
    %c0_3 = arith.constant 0 : index
    %c0_4 = arith.constant 0 : index
    %4 = vector.load %arg3[%c0_3, %c0_4] : memref<32x32xbf16, #tpu.memory_space<vmem>>, vector<32x32xbf16>
    %cst = arith.constant dense<0.000000e+00> : vector<8x32xf32>
    %5 = tpu.matmul %3, %4, %cst {dimension_numbers = #tpu.dot_dimension_numbers<[1], [0], [0], [1], [0, 0, 1, 1], [], []>} : vector<8x32xbf16>, vector<32x32xbf16>, vector<8x32xf32> -> vector<8x32xf32>
    %6 = arith.truncf %1 : vector<8x32xf32> to vector<8x32xbf16>
    %c0_5 = arith.constant 0 : index
    %c0_6 = arith.constant 0 : index
    %7 = vector.load %arg4[%c0_5, %c0_6] : memref<32x32xbf16, #tpu.memory_space<vmem>>, vector<32x32xbf16>
    %cst_7 = arith.constant dense<0.000000e+00> : vector<8x32xf32>
    %8 = tpu.matmul %6, %7, %cst_7 {dimension_numbers = #tpu.dot_dimension_numbers<[1], [0], [0], [1], [0, 0, 1, 1], [], []>} : vector<8x32xbf16>, vector<32x32xbf16>, vector<8x32xf32> -> vector<8x32xf32>
    %9 = arith.addf %5, %8 : vector<8x32xf32>
    %10 = arith.truncf %2 : vector<8x32xf32> to vector<8x32xbf16>
    %c0_8 = arith.constant 0 : index
    %c0_9 = arith.constant 0 : index
    %11 = vector.load %arg5[%c0_8, %c0_9] : memref<32x32xbf16, #tpu.memory_space<vmem>>, vector<32x32xbf16>
    %cst_10 = arith.constant dense<0.000000e+00> : vector<8x32xf32>
    %12 = tpu.matmul %10, %11, %cst_10 {dimension_numbers = #tpu.dot_dimension_numbers<[1], [0], [0], [1], [0, 0, 1, 1], [], []>} : vector<8x32xbf16>, vector<32x32xbf16>, vector<8x32xf32> -> vector<8x32xf32>
    %13 = arith.addf %9, %12 : vector<8x32xf32>
    %c0_11 = arith.constant 0 : index
    %c0_12 = arith.constant 0 : index
    %14 = vector.load %arg9[%c0_11, %c0_12] : memref<3x32xf32, #tpu.memory_space<vmem>>, vector<1x32xf32>
    %15 = vector.broadcast %14 : vector<1x32xf32> to vector<8x32xf32>
    %16 = arith.addf %13, %15 : vector<8x32xf32>
    %cst_13 = arith.constant 0.000000e+00 : f32
    %17 = vector.broadcast %cst_13 : f32 to vector<8x32xf32>
    %18 = arith.maximumf %16, %17 : vector<8x32xf32>
    %19 = arith.truncf %18 : vector<8x32xf32> to vector<8x32xbf16>
    %c0_14 = arith.constant 0 : index
    %c0_15 = arith.constant 0 : index
    %20 = vector.load %arg6[%c0_14, %c0_15] : memref<32x32xbf16, #tpu.memory_space<vmem>>, vector<32x32xbf16>
    %cst_16 = arith.constant dense<0.000000e+00> : vector<8x32xf32>
    %21 = tpu.matmul %19, %20, %cst_16 {dimension_numbers = #tpu.dot_dimension_numbers<[1], [0], [0], [1], [0, 0, 1, 1], [], []>} : vector<8x32xbf16>, vector<32x32xbf16>, vector<8x32xf32> -> vector<8x32xf32>
    %c1 = arith.constant 1 : index
    %c0_17 = arith.constant 0 : index
    %22 = vector.load %arg9[%c1, %c0_17] : memref<3x32xf32, #tpu.memory_space<vmem>>, vector<1x32xf32>
    %23 = vector.broadcast %22 : vector<1x32xf32> to vector<8x32xf32>
    %24 = arith.addf %21, %23 : vector<8x32xf32>
    %cst_18 = arith.constant 0.000000e+00 : f32
    %25 = vector.broadcast %cst_18 : f32 to vector<8x32xf32>
    %26 = arith.maximumf %24, %25 : vector<8x32xf32>
    %27 = arith.truncf %26 : vector<8x32xf32> to vector<8x32xbf16>
    %c0_19 = arith.constant 0 : index
    %c0_20 = arith.constant 0 : index
    %28 = vector.load %arg7[%c0_19, %c0_20] : memref<32x32xbf16, #tpu.memory_space<vmem>>, vector<32x32xbf16>
    %cst_21 = arith.constant dense<0.000000e+00> : vector<8x32xf32>
    %29 = tpu.matmul %27, %28, %cst_21 {dimension_numbers = #tpu.dot_dimension_numbers<[1], [0], [0], [1], [0, 0, 1, 1], [], []>} : vector<8x32xbf16>, vector<32x32xbf16>, vector<8x32xf32> -> vector<8x32xf32>
    %c2 = arith.constant 2 : index
    %c0_22 = arith.constant 0 : index
    %30 = vector.load %arg9[%c2, %c0_22] : memref<3x32xf32, #tpu.memory_space<vmem>>, vector<1x32xf32>
    %31 = vector.broadcast %30 : vector<1x32xf32> to vector<8x32xf32>
    %32 = arith.addf %29, %31 : vector<8x32xf32>
    %cst_23 = arith.constant 0.000000e+00 : f32
    %33 = vector.broadcast %cst_23 : f32 to vector<8x32xf32>
    %34 = arith.maximumf %32, %33 : vector<8x32xf32>
    %35 = arith.truncf %34 : vector<8x32xf32> to vector<8x32xbf16>
    %c0_24 = arith.constant 0 : index
    %c0_25 = arith.constant 0 : index
    %36 = vector.load %arg8[%c0_24, %c0_25] : memref<32x128xbf16, #tpu.memory_space<vmem>>, vector<32x128xbf16>
    %cst_26 = arith.constant dense<0.000000e+00> : vector<8x128xf32>
    %37 = tpu.matmul %35, %36, %cst_26 {dimension_numbers = #tpu.dot_dimension_numbers<[1], [0], [0], [1], [0, 0, 1, 1], [], []>} : vector<8x32xbf16>, vector<32x128xbf16>, vector<8x128xf32> -> vector<8x128xf32>
    %c0_27 = arith.constant 0 : index
    %c0_28 = arith.constant 0 : index
    %38 = vector.load %arg10[%c0_27, %c0_28] : memref<1x128xf32, #tpu.memory_space<vmem>>, vector<1x128xf32>
    %39 = vector.broadcast %38 : vector<1x128xf32> to vector<8x128xf32>
    %40 = arith.addf %37, %39 : vector<8x128xf32>
    %c0_29 = arith.constant 0 : index
    %c0_30 = arith.constant 0 : index
    %41 = vector.load %arg11[%c0_29, %c0_30] : memref<8x128xf32, #tpu.memory_space<vmem>>, vector<8x128xf32>
    tpu.vector_store %arg11[%c0_29, %c0_30], %40 {strides = array<i32>} : memref<8x128xf32, #tpu.memory_space<vmem>>, vector<8x128xf32>,
    return
  }
  func.func @transform_0(%arg0: i32) -> (i32, i32) {
    %c0_i32 = arith.constant 0 : i32
    %c0_i32_0 = arith.constant 0 : i32
    return %arg0, %c0_i32 : i32, i32
  }
  func.func @transform_1(%arg0: i32) -> (i32, i32) {
    %c0_i32 = arith.constant 0 : i32
    %c0_i32_0 = arith.constant 0 : i32
    return %arg0, %c0_i32 : i32, i32
  }
  func.func @transform_2(%arg0: i32) -> (i32, i32) {
    %c0_i32 = arith.constant 0 : i32
    %c0_i32_0 = arith.constant 0 : i32
    %c0_i32_1 = arith.constant 0 : i32
    return %c0_i32, %c0_i32_0 : i32, i32
  }
  func.func @transform_3(%arg0: i32) -> (i32, i32) {
    %c0_i32 = arith.constant 0 : i32
    %c0_i32_0 = arith.constant 0 : i32
    %c0_i32_1 = arith.constant 0 : i32
    return %c0_i32, %c0_i32_0 : i32, i32
  }
  func.func @transform_4(%arg0: i32) -> (i32, i32) {
    %c0_i32 = arith.constant 0 : i32
    %c0_i32_0 = arith.constant 0 : i32
    %c0_i32_1 = arith.constant 0 : i32
    return %c0_i32, %c0_i32_0 : i32, i32
  }
  func.func @transform_5(%arg0: i32) -> (i32, i32) {
    %c0_i32 = arith.constant 0 : i32
    %c0_i32_0 = arith.constant 0 : i32
    %c0_i32_1 = arith.constant 0 : i32
    return %c0_i32, %c0_i32_0 : i32, i32
  }
  func.func @transform_6(%arg0: i32) -> (i32, i32) {
    %c0_i32 = arith.constant 0 : i32
    %c0_i32_0 = arith.constant 0 : i32
    %c0_i32_1 = arith.constant 0 : i32
    return %c0_i32, %c0_i32_0 : i32, i32
  }
  func.func @transform_7(%arg0: i32) -> (i32, i32) {
    %c0_i32 = arith.constant 0 : i32
    %c0_i32_0 = arith.constant 0 : i32
    %c0_i32_1 = arith.constant 0 : i32
    return %c0_i32, %c0_i32_0 : i32, i32
  }
  func.func @transform_8(%arg0: i32) -> (i32, i32) {
    %c0_i32 = arith.constant 0 : i32
    %c0_i32_0 = arith.constant 0 : i32
    %c0_i32_1 = arith.constant 0 : i32
    return %c0_i32, %c0_i32_0 : i32, i32
  }
  func.func @transform_9(%arg0: i32) -> (i32, i32) {
    %c0_i32 = arith.constant 0 : i32
    %c0_i32_0 = arith.constant 0 : i32
    %c0_i32_1 = arith.constant 0 : i32
    return %c0_i32, %c0_i32_0 : i32, i32
  }
  func.func @transform_10(%arg0: i32) -> (i32, i32) {
    %c0_i32 = arith.constant 0 : i32
    %c0_i32_0 = arith.constant 0 : i32
    return %arg0, %c0_i32 : i32, i32
  }
}

</mosaic_0001>

<bundles_post_ra>
// kernel: tpu_custom_call.1
= control target key start
LH: loop header
LB: loop body
LE: loop exit
PB: predicated region body
PF: predicated region fallthrough
CT: control target
= control target key end

     0   :  { %15 = vsyncpa [#allocation3], 0  ;;  %s1062_s0 = inlined_call_operand.hbm [shape: f32[8,32], index: 0, kind: input, shape index: {}]   ;;  %s1063_s1 = inlined_call_operand.hbm [shape: f32[8,32], index: 1, kind: input, shape index: {}]   ;;  %s1064_s2 = inlined_call_operand.hbm [shape: bf16[32,32], index: 2, kind: input, shape index: {}]   ;;  %s1065_s3 = inlined_call_operand.hbm [shape: bf16[32,32], index: 3, kind: input, shape index: {}]   ;;  %s1066_s4 = inlined_call_operand.hbm [shape: bf16[32,32], index: 4, kind: input, shape index: {}]   ;;  %s1067_s5 = inlined_call_operand.vmem [shape: bf16[32,32], index: 5, kind: input, shape index: {}]   ;;  %s1068_s6 = inlined_call_operand.hbm [shape: bf16[32,32], index: 6, kind: input, shape index: {}]   ;;  %s1069_s7 = inlined_call_operand.hbm [shape: bf16[32,128], index: 7, kind: input, shape index: {}]   ;;  %s1070_s8 = inlined_call_operand.vmem [shape: f32[3,32], index: 8, kind: input, shape index: {}]   ;;  %s1071_s9 = inlined_call_operand.vmem [shape: f32[1,128], index: 9, kind: input, shape index: {}]   ;;  %s1072_s10 = inlined_call_operand.hbm [shape: f32[8,128], index: 10, kind: output, shape index: {}]  }
   0x1   :  { %16 = vsyncpa [#allocation6], 0 }
   0x2   :  { %17 = vsyncpa [#allocation9], 0 }
   0x3   :  { %18 = vsyncpa [#allocation12], 0 }
   0x4   :  { %19 = vsyncpa [#allocation4], 0  ;;  %s836_s13 = smov [#allocation5]   ;;  %s650_s17 = scalar_lea.hbm %s1063_s1, 128 }
   0x5   :  { %s36_s14 = sshll.u32 %s836_s13, 4  ;;  %p651_p0 = scmp.ne.s32.totalorder %s1063_s1, %s650_s17  ;;  %s37_s14 = int_to_ptr.vmem [resolvable:$true] %s36_s14 }
   0x6   :  { %p654_p1 = scmp.lt.u32.totalorder %s650_s17, %s1063_s1 }
   0x8   :  { %p656_p2 = pnand %p654_p1, %p651_p0 }
   0xa   :  { %659 = shalt.err (!%p656_p2)
}
   0xb   :  { %s660_s22 = scalar_lea.vmem %s37_s14, 128  ;;  %p665_p4 = scmp.lt.s32.totalorder %s37_s14, %s37_s14 }
   0xc   :  { %p661_p3 = scmp.ne.s32.totalorder %s37_s14, %s660_s22  ;;  %p666_p5 = scmp.lt.s32.totalorder %s660_s22, %s660_s22 }
   0xe   :  { %p667_p6 = por %p666_p5, %p665_p4 }
  0x10   :  { %p668_p7 = pnand %p667_p6, %p661_p3 }
  0x12   :  { %671 = shalt.err (!%p668_p7)
}
  0x13   :  { %39 = dma.hbm_to_vmem [thread:$0]  %s1063_s1, 128, %s37_s14, [#allocation6]  }
  0x14   :  { %s837_s25 = smov [#allocation8]   ;;  %s838_s27 = smov [#allocation11]  }
  0x15   :  { %s57_s26 = sshll.u32 %s837_s25, 4  ;;  %s83_s28 = sshll.u32 %s838_s27, 4  ;;  %s58_s26 = int_to_ptr.vmem [resolvable:$true] %s57_s26  ;;  %s84_s28 = int_to_ptr.vmem [resolvable:$true] %s83_s28 }
  0x16   :  { %s672_s11 = scalar_lea.hbm %s1065_s3, 256 }
  0x17   :  { %p673_p8 = scmp.ne.s32.totalorder %s1065_s3, %s672_s11  ;;  %p676_p9 = scmp.lt.u32.totalorder %s672_s11, %s1065_s3 }
  0x19   :  { %p678_p10 = pnand %p676_p9, %p673_p8 }
  0x1b   :  { %681 = shalt.err (!%p678_p10)
}
  0x1c   :  { %s682_s1 = scalar_lea.vmem %s58_s26, 256  ;;  %p687_p12 = scmp.lt.s32.totalorder %s58_s26, %s58_s26 }
  0x1d   :  { %p683_p11 = scmp.ne.s32.totalorder %s58_s26, %s682_s1  ;;  %p688_p13 = scmp.lt.s32.totalorder %s682_s1, %s682_s1 }
  0x1f   :  { %p689_p0 = por %p688_p13, %p687_p12 }
  0x21   :  { %p690_p1 = pnand %p689_p0, %p683_p11 }
  0x23   :  { %693 = shalt.err (!%p690_p1)
}
  0x24   :  { %s839_s14 = smov 64   ;;  %s840_s17 = smov 4  }
  0x25   :  { %63 = dma.hbm_to_vmem [thread:$0]  %s1065_s3, 256, %s58_s26, [#allocation9], %s839_s14, %s839_s14, %s840_s17  }
  0x26   :  { %s694_s22 = scalar_lea.hbm %s1068_s6, 256 }
  0x27   :  { %p695_p2 = scmp.ne.s32.totalorder %s1068_s6, %s694_s22  ;;  %p698_p3 = scmp.lt.u32.totalorder %s694_s22, %s1068_s6 }
  0x29   :  { %p700_p4 = pnand %p698_p3, %p695_p2 }
  0x2b   :  { %703 = shalt.err (!%p700_p4)
}
  0x2c   :  { %s704_s29 = scalar_lea.vmem %s84_s28, 256  ;;  %p709_p6 = scmp.lt.s32.totalorder %s84_s28, %s84_s28 }
  0x2d   :  { %p705_p5 = scmp.ne.s32.totalorder %s84_s28, %s704_s29  ;;  %p710_p7 = scmp.lt.s32.totalorder %s704_s29, %s704_s29 }
  0x2f   :  { %p711_p8 = por %p710_p7, %p709_p6 }
  0x31   :  { %p712_p9 = pnand %p711_p8, %p705_p5 }
  0x33   :  { %715 = shalt.err (!%p712_p9)
}
  0x34   :  { %89 = dma.hbm_to_vmem [thread:$0]  %s1068_s6, 256, %s84_s28, [#allocation12], %s839_s14, %s839_s14, %s840_s17  }
  0x35   :  { %s841_s30 = smov [#allocation2]   ;;  %s842_s12 = smov [#allocation7]  }
  0x36   :  { %s26_s11 = sshll.u32 %s841_s30, 4  ;;  %s45_s13 = sshll.u32 %s842_s12, 4  ;;  %s27_s11 = int_to_ptr.vmem [resolvable:$true] %s26_s11  ;;  %s46_s13 = int_to_ptr.vmem [resolvable:$true] %s45_s13 }
  0x37   :  { %s716_s1 = scalar_lea.hbm %s1062_s0, 128 }
  0x38   :  { %p717_p10 = scmp.ne.s32.totalorder %s1062_s0, %s716_s1  ;;  %p720_p11 = scmp.lt.u32.totalorder %s716_s1, %s1062_s0 }
  0x3a   :  { %p722_p12 = pnand %p720_p11, %p717_p10 }
  0x3c   :  { %725 = shalt.err (!%p722_p12)
}
  0x3d   :  { %s726_s6 = scalar_lea.vmem %s27_s11, 128  ;;  %p731_p0 = scmp.lt.s32.totalorder %s27_s11, %s27_s11 }
  0x3e   :  { %p727_p13 = scmp.ne.s32.totalorder %s27_s11, %s726_s6  ;;  %p732_p1 = scmp.lt.s32.totalorder %s726_s6, %s726_s6 }
  0x40   :  { %p733_p2 = por %p732_p1, %p731_p0 }
  0x42   :  { %p734_p3 = pnand %p733_p2, %p727_p13 }
  0x44   :  { %737 = shalt.err (!%p734_p3)
}
  0x45   :  { %29 = dma.hbm_to_vmem [thread:$0]  %s1062_s0, 128, %s27_s11, [#allocation3]  }
  0x46   :  { %s738_s25 = scalar_lea.hbm %s1064_s2, 256 }
  0x47   :  { %p739_p4 = scmp.ne.s32.totalorder %s1064_s2, %s738_s25  ;;  %p742_p5 = scmp.lt.u32.totalorder %s738_s25, %s1064_s2 }
  0x49   :  { %p744_p6 = pnand %p742_p5, %p739_p4 }
  0x4b   :  { %747 = shalt.err (!%p744_p6)
}
  0x4c   :  { %s748_s30 = scalar_lea.vmem %s46_s13, 256  ;;  %p753_p8 = scmp.lt.s32.totalorder %s46_s13, %s46_s13 }
  0x4d   :  { %p749_p7 = scmp.ne.s32.totalorder %s46_s13, %s748_s30  ;;  %p754_p9 = scmp.lt.s32.totalorder %s748_s30, %s748_s30 }
  0x4f   :  { %p755_p10 = por %p754_p9, %p753_p8 }
  0x51   :  { %p756_p11 = pnand %p755_p10, %p749_p7 }
  0x53   :  { %759 = shalt.err (!%p756_p11)
}
  0x54   :  { %51 = dma.hbm_to_vmem [thread:$0]  %s1064_s2, 256, %s46_s13, [#allocation6], %s839_s14, %s839_s14, %s840_s17  }
  0x55   :  { %s843_s12 = smov [#allocation10]   ;;  %s844_s16 = smov [#allocation13]  }
  0x56   :  { %s69_s15 = sshll.u32 %s843_s12, 4  ;;  %s95_s1 = sshll.u32 %s844_s16, 4  ;;  %s70_s15 = int_to_ptr.vmem [resolvable:$true] %s69_s15  ;;  %s96_s1 = int_to_ptr.vmem [resolvable:$true] %s95_s1 }
  0x57   :  { %s760_s20 = scalar_lea.hbm %s1066_s4, 256 }
  0x58   :  { %p761_p12 = scmp.ne.s32.totalorder %s1066_s4, %s760_s20  ;;  %p764_p13 = scmp.lt.u32.totalorder %s760_s20, %s1066_s4 }
  0x5a   :  { %p766_p0 = pnand %p764_p13, %p761_p12 }
  0x5c   :  { %769 = shalt.err (!%p766_p0)
}
  0x5d   :  { %s770_s2 = scalar_lea.vmem %s70_s15, 256  ;;  %p775_p2 = scmp.lt.s32.totalorder %s70_s15, %s70_s15 }
  0x5e   :  { %p771_p1 = scmp.ne.s32.totalorder %s70_s15, %s770_s2  ;;  %p776_p3 = scmp.lt.s32.totalorder %s770_s2, %s770_s2 }
  0x60   :  { %p777_p4 = por %p776_p3, %p775_p2 }
  0x62   :  { %p778_p5 = pnand %p777_p4, %p771_p1 }
  0x64   :  { %781 = shalt.err (!%p778_p5)
}
  0x65   :  { %75 = dma.hbm_to_vmem [thread:$0]  %s1066_s4, 256, %s70_s15, [#allocation9], %s839_s14, %s839_s14, %s840_s17  }
  0x66   :  { %s782_s27 = scalar_lea.hbm %s1069_s7, 256 }
  0x67   :  { %p783_p6 = scmp.ne.s32.totalorder %s1069_s7, %s782_s27  ;;  %p786_p7 = scmp.lt.u32.totalorder %s782_s27, %s1069_s7 }
  0x69   :  { %p788_p8 = pnand %p786_p7, %p783_p6 }
  0x6b   :  { %791 = shalt.err (!%p788_p8)
}
  0x6c   :  { %s792_s0 = scalar_lea.vmem %s96_s1, 256  ;;  %p797_p10 = scmp.lt.s32.totalorder %s96_s1, %s96_s1 }
  0x6d   :  { %p793_p9 = scmp.ne.s32.totalorder %s96_s1, %s792_s0  ;;  %p798_p11 = scmp.lt.s32.totalorder %s792_s0, %s792_s0 }
  0x6f   :  { %p799_p12 = por %p798_p11, %p797_p10 }
  0x71   :  { %p800_p13 = pnand %p799_p12, %p793_p9 }
  0x73   :  { %803 = shalt.err (!%p800_p13)
}
  0x74   :  { %101 = dma.hbm_to_vmem [thread:$0]  %s1069_s7, 256, %s96_s1, [#allocation12], %s839_s14, %s839_s14, %s840_s17  }
  0x75   :  { %826 = dma.done.wait [#allocation3], 128  }
  0x76   :  { %827 = vsyncadd [#allocation3], 4294967168 }
  0x77   :  { %828 = dma.done.wait [#allocation6], 384  }
  0x78   :  { %829 = vsyncadd [#allocation6], 4294966912 }
  0x79   :  { %830 = dma.done.wait [#allocation9], 512  }
  0x7a   :  { %831 = vsyncadd [#allocation9], 4294966784 }
  0x7b   :  { %832 = dma.done.wait [#allocation12], 512  }
  0x7c   :  { %833 = vsyncadd [#allocation12], 4294966784  ;;  %v845_v0 = vmov 0.0   ;;  %vm846_vm0 = vmmov 0   ;;  %v638_v1 = vld [vmem:[#allocation8] sm:$0xff]   ;;  %v639_v2 = vld [vmem:[#allocation7] sm:$0xff]  }
  0x7d   :  { %578 = vmatprep.subr.bf16.mxu0 %v845_v0  ;;  %586 = vmatprep.subr.bf16.mxu1 %v845_v0  ;;  %v640_v3 = vld [vmem:[#allocation8 + $0x8] sm:$0xff]   ;;  %v641_v4 = vld [vmem:[#allocation7 + $0x8] sm:$0xff]   ;;  %v128_v6 = vld [vmem:[#allocation2] sm:$0xff]  ;;  %vm153_vm1 = vcmask 261120   ;;  %s847_s6 = smov [#allocation14]  }
  0x7e   :  { %582 = vmatprep.mubr.msk.bf16.mxu0 %vm846_vm0, %v845_v0  ;;  %590 = vmatprep.mubr.msk.bf16.mxu1 %vm846_vm0, %v845_v0  ;;  %v129_v5 = vld [vmem:[#allocation5] sm:$0xff]  ;;  %v131_v8 = vpack.c.bf16 %v128_v6, %v128_v6  ;;  %v642_v9 = vld [vmem:[#allocation10] sm:$0xff]   ;;  %v643_v11 = vld [vmem:[#allocation10 + $0x8] sm:$0xff]   ;;  %s526_s28 = sshll.u32 %s847_s6, 4  ;;  %s527_s28 = int_to_ptr.vmem [resolvable:$true] %s526_s28 }
  0x7f   :  { %579 = vmatpush3.bf16.msra.mxu0 %v638_v1  ;;  %587 = vmatpush3.bf16.msra.mxu1 %v639_v2  ;;  %v136_v7 = vpack.c.bf16 %v129_v5, %v129_v5  ;;  %v130_v10 = vmul.f32 %v129_v5, %v128_v6  ;;  %v644_v13 = vld [vmem:[%s1067_s5] sm:$0xff]   ;;  %v645_v14 = vld [vmem:[%s1067_s5 + $0x8] sm:$0xff]   ;;  %v646_v33 = vld [vmem:[#allocation11] sm:$0xff]   ;;  %p809_p1 = scmp.lt.s32.totalorder %s527_s28, %s527_s28 }
  0x80   :  { %580 = vmatprep.subr.bf16.mxu0 %v845_v0  ;;  %588 = vmatprep.subr.bf16.mxu1 %v845_v0  ;;  %v547_v25 = vld [vmem:[%s1070_s8] ss:$0 sm:$0xff]  ;;  %v647_v34 = vld [vmem:[#allocation11 + $0x8] sm:$0xff]   ;;  %v548_v35 = vld [vmem:[%s1070_s8 + $0x1] ss:$0 sm:$0xff] }
  0x81   :  { %v252_v12 = vpack.c.bf16 %v130_v10, %v130_v10  ;;  %v648_v43 = vld [vmem:[#allocation13] sm:$0xff]   ;;  %v649_v44 = vld [vmem:[#allocation13 + $0x8] sm:$0xff]  }
  0x82   :  { %v552_v45 = vld [vmem:[%s1070_s8 + $0x2] ss:$0 sm:$0xff]  ;;  %v556_v53 = vld [vmem:[%s1071_s9] ss:$0 sm:$0xff]  ;;  %s804_s8 = scalar_lea.vmem %s527_s28, 128 }
  0x83   :  { %581 = vmatpush3.bf16.msra.mxu0 %v640_v3  ;;  %589 = vmatpush3.bf16.msra.mxu1 %v641_v4  ;;  %p805_p0 = scmp.ne.s32.totalorder %s527_s28, %s804_s8  ;;  %p810_p2 = scmp.lt.s32.totalorder %s804_s8, %s804_s8 }
  0x84   :  { %594 = vmatprep.subr.bf16.mxu0 %v845_v0  ;;  %602 = vmatprep.subr.bf16.mxu1 %v845_v0 }
  0x85   :  { %p811_p3 = por %p810_p2, %p809_p1 }
  0x86   :  { %583 = vmatmul.mubr.msk.bf16.vlgmr.msra.gmra.mrb[0].mxu0 %vm153_vm1, %v136_v7  ;;  %591 = vmatmul.mubr.msk.bf16.vlgmr.msra.gmra.mrb[0].mxu1 %vm153_vm1, %v131_v8 }
  0x87   :  { %595 = vmatpush3.bf16.msra.mxu0 %v642_v9  ;;  %598 = vmatprep.mubr.msk.bf16.mxu0 %vm846_vm0, %v845_v0  ;;  %p812_p4 = pnand %p811_p3, %p805_p0 }
  0x88   :  { %596 = vmatprep.subr.bf16.mxu0 %v845_v0  ;;  %606 = vmatprep.mubr.msk.bf16.mxu1 %vm846_vm0, %v845_v0 }
  0x89   :  { %603 = vmatpush3.bf16.msra.mxu1 %v644_v13 }
  0x8a   :  { %604 = vmatprep.subr.bf16.mxu1 %v845_v0 }
  0x8b   :  { %597 = vmatpush3.bf16.msra.mxu0 %v643_v11 }
  0x8c   :  { %610 = vmatprep.subr.bf16.mxu0 %v845_v0 }
  0x8d   :  { %605 = vmatpush3.bf16.msra.mxu1 %v645_v14 }
  0x8e   :  { %599 = vmatmul.mubr.msk.bf16.vlgmr.msra.gmra.mrb[4].mxu0 %vm153_vm1, %v252_v12  ;;  %618 = vmatprep.subr.bf16.mxu1 %v845_v0 }
  0x8f   :  { %614 = vmatprep.mubr.msk.bf16.mxu0 %vm846_vm0, %v845_v0  ;;  %611 = vmatpush3.bf16.msra.mxu0 %v646_v33 }
  0x90   :  { %612 = vmatprep.subr.bf16.mxu0 %v845_v0 }
  0x93   :  { %613 = vmatpush3.bf16.msra.mxu0 %v647_v34 }
 0x159   :  { %v191_v15 = vpop.f32.mrb[0].mxu0  ;;  %v246_v17 = vpop.f32.mrb[0].mxu1 }
 0x15a   :  { %v584_v16 = vpop.f32.mrb[1].mxu0  ;;  %v247_v18 = vadd.f32 %v246_v17, %v191_v15  ;;  %v592_v20 = vpop.f32.mrb[1].mxu1 }
 0x15b   :  { %v194_v19 = vpop.f32.mrb[2].mxu0  ;;  %v249_v22 = vpop.f32.mrb[2].mxu1 }
 0x15c   :  { %v585_v21 = vpop.f32.mrb[3].mxu0  ;;  %v593_v23 = vpop.f32.mrb[3].mxu1 }
 0x161   :  { %v306_v24 = vpop.f32.mrb[4].mxu0 }
 0x162   :  { %v312_v26 = vadd.f32 %v306_v24, %v247_v18  ;;  %v600_v27 = vpop.f32.mrb[5].mxu0 }
 0x163   :  { %v309_v28 = vpop.f32.mrb[6].mxu0 }
 0x164   :  { %v318_v29 = vadd.f32 %v547_v25, %v312_v26  ;;  %v601_v30 = vpop.f32.mrb[7].mxu0 }
 0x166   :  { %v319_v31 = vmax.f32 %v318_v29, 0.0 }
 0x168   :  { %v320_v32 = vpack.c.bf16 %v319_v31, %v319_v31 }
 0x16a   :  { %607 = vmatmul.mubr.msk.bf16.vlgmr.msra.gmra.mrb[4].mxu1 %vm153_vm1, %v320_v32 }
 0x16b   :  { %622 = vmatprep.mubr.msk.bf16.mxu1 %vm846_vm0, %v845_v0  ;;  %619 = vmatpush3.bf16.msra.mxu1 %v648_v43 }
 0x16c   :  { %620 = vmatprep.subr.bf16.mxu1 %v845_v0 }
 0x16f   :  { %621 = vmatpush3.bf16.msra.mxu1 %v649_v44 }
 0x23d   :  { %v379_v36 = vpop.f32.mrb[4].mxu1 }
 0x23e   :  { %v380_v37 = vadd.f32 %v548_v35, %v379_v36  ;;  %v608_v38 = vpop.f32.mrb[5].mxu1 }
 0x23f   :  { %v382_v39 = vpop.f32.mrb[6].mxu1 }
 0x240   :  { %v385_v40 = vmax.f32 %v380_v37, 0.0  ;;  %v609_v41 = vpop.f32.mrb[7].mxu1 }
 0x242   :  { %v386_v42 = vpack.c.bf16 %v385_v40, %v385_v40 }
 0x244   :  { %615 = vmatmul.mubr.msk.bf16.vlgmr.msra.gmra.mrb[8].mxu0 %vm153_vm1, %v386_v42 }
 0x317   :  { %v445_v46 = vpop.f32.mrb[8].mxu0 }
 0x318   :  { %v446_v47 = vadd.f32 %v552_v45, %v445_v46  ;;  %v616_v48 = vpop.f32.mrb[9].mxu0 }
 0x319   :  { %v448_v49 = vpop.f32.mrb[10].mxu0 }
 0x31a   :  { %v451_v50 = vmax.f32 %v446_v47, 0.0  ;;  %v617_v51 = vpop.f32.mrb[11].mxu0 }
 0x31c   :  { %v452_v52 = vpack.c.bf16 %v451_v50, %v451_v50 }
 0x31e   :  { %623 = vmatmul.mubr.msk.bf16.vlgmr.msra.gmra.mrb[8].mxu1 %vm153_vm1, %v452_v52 }
 0x3f1   :  { %v513_v54 = vpop.f32.mrb[8].mxu1 }
 0x3f2   :  { %v514_v55 = vadd.f32 %v556_v53, %v513_v54  ;;  %v624_v56 = vpop.f32.mrb[9].mxu1 }
 0x3f3   :  { %v516_v57 = vpop.f32.mrb[10].mxu1 }
 0x3f4   :  { %519 = vst [vmem:[#allocation14] sm:$0xff] %v514_v55  ;;  %v625_v58 = vpop.f32.mrb[11].mxu1 }
 0x3f5   :  { %815 = shalt.err (!%p812_p4)
}
 0x3f6   :  { %s816_s9 = scalar_lea.hbm %s1072_s10, 128 }
 0x3f7   :  { %p817_p5 = scmp.ne.s32.totalorder %s1072_s10, %s816_s9  ;;  %p820_p6 = scmp.lt.u32.totalorder %s816_s9, %s1072_s10 }
 0x3f9   :  { %p822_p7 = pnand %p820_p6, %p817_p5 }
 0x3fb   :  { %825 = shalt.err (!%p822_p7)
}
 0x3fc   :  { %529 = dma.vmem_to_hbm [thread:$0]  %s527_s28, 128, %s1072_s10, [#allocation4]  }
 0x3fd   :  { %834 = dma.done.wait [#allocation4], 128  }
 0x3fe   :  { %835 = vsyncadd [#allocation4], 4294967168 }
 0x3ff   :  { %533 = vsyncpa [#allocation3], 1 }
 0x400   :  { %534 = vsyncpa [#allocation6], 1 }
 0x401   :  { %535 = vsyncpa [#allocation9], 1 }
 0x402   :  { %536 = vsyncpa [#allocation12], 1 }
 0x403   :  { %537 = vsyncpa [#allocation4], 1 }

</bundles_post_ra>
